<compile_context>
chip_gen: v5e
topology: v5e:2x2
jax: 0.10.0
libtpu: 0.0.40
codegen_flags: <defaults>
</compile_context>

<pallas_src>
import functools

import jax
import jax.numpy as jnp
from jax import lax
from jax.experimental import pallas as pl
from jax.experimental.pallas import tpu as pltpu


def _pad_up(n, m):
    return -(-n // m) * m


def _buf_bytes(shape, itemsize):
    """VMEM footprint of one buffer with (8, 128) tile padding on the last two dims."""
    s = list(shape)
    s[-1] = _pad_up(s[-1], 128)
    if len(s) >= 2:
        s[-2] = _pad_up(s[-2], 8)
    n = 1
    for d in s:
        n *= d
    return n * itemsize


def _attention_kernel(x_ref, wq_ref, bq_ref, wk_ref, bk_ref, wv_ref, bv_ref,
                      wo_ref, bo_ref, out_ref, attnw_ref,
                      qh_scr, kh_scr, kvw_scr,
                      *, num_heads, head_dim, q_tile):
    """One (batch element, query tile) cell per grid step.

    x_ref:     (1, L, E)       VMEM, compute dtype (bf16/f32)
    w*_ref:    (E, E)          VMEM, compute dtype, stored (in, out)
    b*_ref:    (1, E)          VMEM, f32
    out_ref:   (1, TQ, E)      VMEM, f32
    attnw_ref: (1, H, TQ, L)   VMEM, f32 (or bf16 if requested)
    qh_scr:    (H, TQ, Dh)     VMEM scratch, compute dtype
    kh_scr:    (H, L,  Dh)     VMEM scratch, compute dtype (persists across t)
    kvw_scr:   (E, E)          VMEM scratch, compute dtype (persists across t);
                               rows [h*Dh:(h+1)*Dh] hold (K_h^T V_h) @ Wo_h
    """
    f32 = jnp.float32
    cdt = x_ref.dtype
    L = x_ref.shape[1]

    # ---- Once per batch element: K/V projections and (K^T V) Wo, cached in
    # scratch across the query-tile grid axis (axis 1, "arbitrary"). ----------
    @pl.when(pl.program_id(1) == 0)
    def _():
        x = x_ref[0]                                                    # (L, E)
        k = jnp.dot(x, wk_ref[...], preferred_element_type=f32) + bk_ref[0]
        v = jnp.dot(x, wv_ref[...], preferred_element_type=f32) + bv_ref[0]
        for h in range(num_heads):
            sl = slice(h * head_dim, (h + 1) * head_dim)
            kh = k[:, sl].astype(cdt)                                   # (L, Dh)
            vh = v[:, sl].astype(cdt)                                   # (L, Dh)
            kh_scr[h] = kh
            # No softmax => the AV product reassociates: kv_h = K_h^T @ V_h.
            kv_h = lax.dot_general(kh, vh, (((0,), (0,)), ((), ())),
                                   preferred_element_type=f32)          # (Dh, Dh)
            # Fold this head's out_proj rows: (Dh, E), lane-dense store.
            kvw_scr[sl, :] = jnp.dot(kv_h.astype(cdt), wo_ref[sl, :],
                                     preferred_element_type=f32).astype(cdt)

    # ---- Per query tile -----------------------------------------------------
    if q_tile == L:
        xq = x_ref[0]                                                   # (TQ, E)
    else:
        q0 = pl.multiple_of(pl.program_id(1) * q_tile, q_tile)
        xq = x_ref[0, pl.ds(q0, q_tile), :]                             # (TQ, E)

    # 1/sqrt(head_dim) is pre-folded into wq / bq on the host.
    q = jnp.dot(xq, wq_ref[...], preferred_element_type=f32) + bq_ref[0]
    qc = q.astype(cdt)
    for h in range(num_heads):
        qh_scr[h] = qc[:, h * head_dim:(h + 1) * head_dim]

    # attn_weights = Q K^T (NO softmax in this module); one lane-dense store
    # of the whole (H, TQ, L) slab.
    s = jnp.einsum("hqd,hkd->hqk", qh_scr[...], kh_scr[...],
                   preferred_element_type=f32)                          # (H, TQ, L)
    attnw_ref[0] = s.astype(attnw_ref.dtype)

    # dropout(p, training=False) is the identity.
    # TODO(synk): training-mode dropout (pltpu.prng_*) not implemented.

    # attn_output @ out_proj via one deep matmul against the cached,
    # block-stacked (K^T V) Wo matrix.
    out = jnp.dot(qc, kvw_scr[...], preferred_element_type=f32) + bo_ref[0]
    out_ref[0] = out.astype(out_ref.dtype)


def prompt_generator_attention(x, params, num_heads, *,
                               compute_dtype=jnp.bfloat16,
                               attn_weights_dtype=jnp.float32,
                               q_tile=None):
    """Returns (attn_output (B, L, E) f32,
                attn_weights (B*num_heads, L, L) attn_weights_dtype)."""
    B, L, E = x.shape
    head_dim = E // num_heads
    assert head_dim * num_heads == E, "embed_dim must be divisible by num_heads"
    scaling = head_dim ** (-0.5)

    cdt = jnp.dtype(compute_dtype)
    awdt = jnp.dtype(attn_weights_dtype)
    f32 = jnp.float32
    cbytes = cdt.itemsize
    H, Dh = num_heads, head_dim

    # ---- Generation-aware VMEM budget (v5e/v6e: 128 MiB, v7x: 64 MiB). ------
    try:
        vmem_cap = int(pltpu.get_tpu_info().vmem_capacity_bytes)
    except Exception:                      # conservative fallback (v7x per-core)
        vmem_cap = 64 << 20
    budget = max(int(vmem_cap * 0.78), 32 << 20)   # ~100 MiB / ~50 MiB caps

    # ---- Single-buffer the constant-index weight blocks when big enough to
    # matter (halves resident weight VMEM at large E). ------------------------
    const_kwargs = {}
    weight_bufs = 2
    w_bytes_db = 2 * 4 * (_buf_bytes((E, E), cbytes) + _buf_bytes((1, E), 4))
    if w_bytes_db > (8 << 20):
        try:
            pl.BlockSpec((E, E), lambda b, t: (0, 0), pipeline_mode=pl.Buffered(1))
            const_kwargs = dict(pipeline_mode=pl.Buffered(1))
            weight_bufs = 1
        except (AttributeError, TypeError):
            pass   # older API: keep default double-buffering

    def _resident(tq):
        """Resident-VMEM estimate: pipeline blocks + scratch + in-kernel f32 temps."""
        return (2 * _buf_bytes((1, L, E), cbytes)                        # x
                + weight_bufs * 4 * _buf_bytes((E, E), cbytes)           # weights
                + weight_bufs * 4 * _buf_bytes((1, E), 4)                # biases
                + 2 * _buf_bytes((1, tq, E), 4)                          # out
                + 2 * _buf_bytes((1, H, tq, L), awdt.itemsize)           # attn_weights
                + _buf_bytes((H, tq, Dh), cbytes)                        # qh scratch
                + _buf_bytes((H, L, Dh), cbytes)                         # kh scratch
                + _buf_bytes((E, E), cbytes)                             # kvw scratch
                + _buf_bytes((H, tq, L), 4)                              # QK^T value
                + 2 * _buf_bytes((L, E), 4)                              # K/V f32 temps
                + 2 * _buf_bytes((tq, E), 4))                            # Q/out f32 temps

    # ---- VMEM-aware query tile: largest divisor of L whose resident set fits.
    if q_tile is None:
        divisors = [d for d in range(L, 0, -1) if L % d == 0]
        fitting = [d for d in divisors if _resident(d) <= budget]
        if fitting:
            q_tile = fitting[0]
        else:
            small = [d for d in divisors if d >= 8]
            q_tile = small[-1] if small else divisors[-1]
            # TODO(synk): add a head-chunk grid axis for attn_weights when even
            # the smallest query tile cannot fit the (H, TQ, L) block in VMEM.
    assert L % q_tile == 0
    n_qt = L // q_tile

    vmem_limit = int(min(budget, max(32 << 20, _resident(q_tile) + (4 << 20))))

    # ---- Host-side prep: fold 1/sqrt(head_dim) into the q projection, cast
    # MXU operands to the compute dtype (halves weight DMA/VMEM for bf16). ----
    wq = (params["wq"] * scaling).astype(cdt)
    bq = (params["bq"] * scaling).astype(f32)
    wk = params["wk"].astype(cdt)
    bk = params["bk"].astype(f32)
    wv = params["wv"].astype(cdt)
    bv = params["bv"].astype(f32)
    wo = params["wo"].astype(cdt)
    bo = params["bo"].astype(f32)
    xc = x.astype(cdt)

    kernel = functools.partial(_attention_kernel, num_heads=H, head_dim=Dh,
                               q_tile=q_tile)

    w_spec = pl.BlockSpec((E, E), lambda b, t: (0, 0), **const_kwargs)
    b_spec = pl.BlockSpec((1, E), lambda b, t: (0, 0), **const_kwargs)

    # Advisory cost hint: runtime is dominated by the (B, H, L, L) writeback.
    flops = 2 * B * (4 * L * E * E + H * L * L * Dh + H * L * Dh * Dh
                     + H * Dh * Dh * E)
    bytes_accessed = (B * L * E * cbytes + 4 * E * E * cbytes + 4 * E * 4
                      + B * L * E * 4 + B * H * L * L * awdt.itemsize)
    cost = pl.CostEstimate(flops=int(flops), transcendentals=0,
                           bytes_accessed=int(bytes_accessed))

    out, attnw = pl.pallas_call(
        kernel,
        out_shape=(jax.ShapeDtypeStruct((B, L, E), f32),
                   jax.ShapeDtypeStruct((B, H, L, L), awdt)),
        grid=(B, n_qt),
        in_specs=[pl.BlockSpec((1, L, E), lambda b, t: (b, 0, 0)),
                  w_spec, b_spec,      # q_proj (scaling folded in)
                  w_spec, b_spec,      # k_proj
                  w_spec, b_spec,      # v_proj
                  w_spec, b_spec],     # out_proj
        out_specs=(pl.BlockSpec((1, q_tile, E), lambda b, t: (b, t, 0)),
                   pl.BlockSpec((1, H, q_tile, L), lambda b, t: (b, 0, t, 0))),
        scratch_shapes=[pltpu.VMEM((H, q_tile, Dh), cdt),
                        pltpu.VMEM((H, L, Dh), cdt),
                        pltpu.VMEM((E, E), cdt)],
        compiler_params=pltpu.CompilerParams(
            dimension_semantics=("parallel", "arbitrary"),
            vmem_limit_bytes=vmem_limit),
        cost_estimate=cost,
    )(xc, wq, bq, wk, bk, wv, bv, wo, bo)

    # Match PyTorch: attn_weights shaped (bsz * num_heads, tgt_len, src_len).
    return out, attnw.reshape(B * H, L, L)


def _reference(x, params, num_heads):
    """Pure-JAX f32 reference mirroring the PyTorch forward exactly."""
    B, L, E = x.shape
    Dh = E // num_heads
    scaling = Dh ** (-0.5)
    q = (x @ params["wq"] + params["bq"][0]) * scaling
    k = x @ params["wk"] + params["bk"][0]
    v = x @ params["wv"] + params["bv"][0]

    def _shape(t):
        return (t.reshape(B, L, num_heads, Dh)
                 .transpose(0, 2, 1, 3)
                 .reshape(B * num_heads, L, Dh))

    q, k, v = _shape(q), _shape(k), _shape(v)
    aw = jnp.einsum("bqd,bkd->bqk", q, k)          # no softmax
    ao = jnp.einsum("bqk,bkd->bqd", aw, v)
    ao = (ao.reshape(B, num_heads, L, Dh)
            .transpose(0, 2, 1, 3)
            .reshape(B, L, E))
    out = ao @ params["wo"] + params["bo"][0]
    return out, aw


def _init_params(key, embed_dim):
    keys = jax.random.split(key, 8)
    scale = 1.0 / jnp.sqrt(embed_dim)
    params = {}
    for i, name in enumerate(("q", "k", "v", "o")):
        params[f"w{name}"] = (jax.random.normal(keys[2 * i], (embed_dim, embed_dim),
                                                dtype=jnp.float32) * scale)
        params[f"b{name}"] = (jax.random.normal(keys[2 * i + 1], (1, embed_dim),
                                                dtype=jnp.float32) * scale)
    return params


if __name__ == "__main__":
    B, L, E, H = 2, 8, 32, 4          # batch, seq, embed_dim, num_heads (head_dim=8)

    root = jax.random.PRNGKey(0)
    kx, kp, kx2 = jax.random.split(root, 3)
    x = jax.random.normal(kx, (B, L, E), dtype=jnp.float32)
    params = _init_params(kp, E)

    ref_out, ref_attnw = _reference(x, params, H)

    # f32 compute path: module semantics up to float reassociation of the AV
    # product / out_proj (valid because there is no softmax) -> tight tolerance.
    out32, aw32 = prompt_generator_attention(x, params, H,
                                             compute_dtype=jnp.float32)
    jax.block_until_ready((out32, aw32))
    assert out32.shape == (B, L, E)
    assert aw32.shape == (B * H, L, L)
    assert jnp.allclose(out32, ref_out, atol=1e-3, rtol=1e-3)
    assert jnp.allclose(aw32, ref_attnw, atol=1e-3, rtol=1e-3)

    # Default bf16-MXU path (f32 accumulation): looser tolerance vs f32 ref.
    out_bf, aw_bf = prompt_generator_attention(x, params, H)
    jax.block_until_ready((out_bf, aw_bf))
    assert out_bf.shape == (B, L, E)
    assert aw_bf.shape == (B * H, L, L)
    assert jnp.allclose(out_bf, ref_out, atol=3e-1, rtol=8e-2)
    assert jnp.allclose(aw_bf, ref_attnw, atol=3e-1, rtol=8e-2)

    # Multi-tile path: exercises the cached-K/V (@pl.when(t == 0)) branch and
    # dynamic query-tile slicing.
    B2, L2 = 1, 16
    x2 = jax.random.normal(kx2, (B2, L2, E), dtype=jnp.float32)
    ref_out2, ref_aw2 = _reference(x2, params, H)
    out2, aw2 = prompt_generator_attention(x2, params, H,
                                           compute_dtype=jnp.float32, q_tile=8)
    jax.block_until_ready((out2, aw2))
    assert out2.shape == (B2, L2, E)
    assert aw2.shape == (B2 * H, L2, L2)
    assert jnp.allclose(out2, ref_out2, atol=1e-3, rtol=1e-3)
    assert jnp.allclose(aw2, ref_aw2, atol=1e-3, rtol=1e-3)

    print("KERNEL_OK")
</pallas_src>

<mosaic_0001>
module attributes {stable_mosaic.version = 11 : i64} {
  func.func @_attention_kernel(%arg0: i32, %arg1: i32, %arg2: memref<1x8x32xf32, #tpu.memory_space<vmem>>, %arg3: memref<32x32xf32, #tpu.memory_space<vmem>>, %arg4: memref<1x32xf32, #tpu.memory_space<vmem>>, %arg5: memref<32x32xf32, #tpu.memory_space<vmem>>, %arg6: memref<1x32xf32, #tpu.memory_space<vmem>>, %arg7: memref<32x32xf32, #tpu.memory_space<vmem>>, %arg8: memref<1x32xf32, #tpu.memory_space<vmem>>, %arg9: memref<32x32xf32, #tpu.memory_space<vmem>>, %arg10: memref<1x32xf32, #tpu.memory_space<vmem>>, %arg11: memref<1x8x32xf32, #tpu.memory_space<vmem>>, %arg12: memref<1x4x8x8xf32, #tpu.memory_space<vmem>>, %arg13: memref<4x8x8xf32, #tpu.memory_space<vmem>>, %arg14: memref<4x8x8xf32, #tpu.memory_space<vmem>>, %arg15: memref<32x32xf32, #tpu.memory_space<vmem>>) attributes {dimension_semantics = [#tpu.dimension_semantics<parallel>, #tpu.dimension_semantics<arbitrary>], iteration_bounds = array<i64: 2, 1>, scalar_prefetch = 0 : i64, scratch_operands = 3 : i64, tpu.core_type = #tpu.core_type<tc>, window_params = [{transform_indices = @transform_0, window_bounds = array<i64: 1, 8, 32>}, {pipeline_mode = #tpu.pipeline_mode<synchronous>, transform_indices = @transform_1, window_bounds = array<i64: 32, 32>}, {pipeline_mode = #tpu.pipeline_mode<synchronous>, transform_indices = @transform_2, window_bounds = array<i64: 1, 32>}, {pipeline_mode = #tpu.pipeline_mode<synchronous>, transform_indices = @transform_3, window_bounds = array<i64: 32, 32>}, {pipeline_mode = #tpu.pipeline_mode<synchronous>, transform_indices = @transform_4, window_bounds = array<i64: 1, 32>}, {pipeline_mode = #tpu.pipeline_mode<synchronous>, transform_indices = @transform_5, window_bounds = array<i64: 32, 32>}, {pipeline_mode = #tpu.pipeline_mode<synchronous>, transform_indices = @transform_6, window_bounds = array<i64: 1, 32>}, {pipeline_mode = #tpu.pipeline_mode<synchronous>, transform_indices = @transform_7, window_bounds = array<i64: 32, 32>}, {pipeline_mode = #tpu.pipeline_mode<synchronous>, transform_indices = @transform_8, window_bounds = array<i64: 1, 32>}, {transform_indices = @transform_9, window_bounds = array<i64: 1, 8, 32>}, {transform_indices = @transform_10, window_bounds = array<i64: 1, 4, 8, 8>}]} {
    %c0_i32 = arith.constant 0 : i32
    %0 = arith.cmpi eq, %arg1, %c0_i32 : i32
    %1 = arith.extui %0 : i1 to i32
    %c0_i32_0 = arith.constant 0 : i32
    %2 = arith.cmpi ne, %1, %c0_i32_0 : i32
    scf.if %2 {
      %c0_35 = arith.constant 0 : index
      %c0_36 = arith.constant 0 : index
      %c0_37 = arith.constant 0 : index
      %44 = vector.load %arg2[%c0_35, %c0_36, %c0_37] : memref<1x8x32xf32, #tpu.memory_space<vmem>>, vector<1x8x32xf32>
      %45 = vector.shape_cast %44 : vector<1x8x32xf32> to vector<8x32xf32>
      %c0_38 = arith.constant 0 : index
      %c0_39 = arith.constant 0 : index
      %46 = vector.load %arg5[%c0_38, %c0_39] : memref<32x32xf32, #tpu.memory_space<vmem>>, vector<32x32xf32>
      %cst_40 = arith.constant dense<0.000000e+00> : vector<8x32xf32>
      %47 = tpu.matmul %45, %46, %cst_40 {dimension_numbers = #tpu.dot_dimension_numbers<[1], [0], [0], [1], [0, 0, 1, 1], [], []>} : vector<8x32xf32>, vector<32x32xf32>, vector<8x32xf32> -> vector<8x32xf32>
      %c0_41 = arith.constant 0 : index
      %c0_42 = arith.constant 0 : index
      %48 = vector.load %arg6[%c0_41, %c0_42] : memref<1x32xf32, #tpu.memory_space<vmem>>, vector<1x32xf32>
      %49 = vector.shape_cast %48 : vector<1x32xf32> to vector<32xf32>
      %50 = vector.shape_cast %49 : vector<32xf32> to vector<1x32xf32>
      %51 = vector.broadcast %50 : vector<1x32xf32> to vector<8x32xf32>
      %52 = arith.addf %47, %51 : vector<8x32xf32>
      %c0_43 = arith.constant 0 : index
      %c0_44 = arith.constant 0 : index
      %53 = vector.load %arg7[%c0_43, %c0_44] : memref<32x32xf32, #tpu.memory_space<vmem>>, vector<32x32xf32>
      %cst_45 = arith.constant dense<0.000000e+00> : vector<8x32xf32>
      %54 = tpu.matmul %45, %53, %cst_45 {dimension_numbers = #tpu.dot_dimension_numbers<[1], [0], [0], [1], [0, 0, 1, 1], [], []>} : vector<8x32xf32>, vector<32x32xf32>, vector<8x32xf32> -> vector<8x32xf32>
      %c0_46 = arith.constant 0 : index
      %c0_47 = arith.constant 0 : index
      %55 = vector.load %arg8[%c0_46, %c0_47] : memref<1x32xf32, #tpu.memory_space<vmem>>, vector<1x32xf32>
      %56 = vector.shape_cast %55 : vector<1x32xf32> to vector<32xf32>
      %57 = vector.shape_cast %56 : vector<32xf32> to vector<1x32xf32>
      %58 = vector.broadcast %57 : vector<1x32xf32> to vector<8x32xf32>
      %59 = arith.addf %54, %58 : vector<8x32xf32>
      %60 = vector.extract_strided_slice %52 {offsets = [0, 0], sizes = [8, 8], strides = [1, 1]} : vector<8x32xf32> to vector<8x8xf32>
      %61 = vector.extract_strided_slice %59 {offsets = [0, 0], sizes = [8, 8], strides = [1, 1]} : vector<8x32xf32> to vector<8x8xf32>
      %c0_48 = arith.constant 0 : index
      %c0_49 = arith.constant 0 : index
      %c0_50 = arith.constant 0 : index
      %62 = vector.load %arg14[%c0_48, %c0_49, %c0_50] : memref<4x8x8xf32, #tpu.memory_space<vmem>>, vector<1x8x8xf32>
      %63 = vector.shape_cast %62 : vector<1x8x8xf32> to vector<8x8xf32>
      %64 = vector.shape_cast %60 : vector<8x8xf32> to vector<1x8x8xf32>
      tpu.vector_store %arg14[%c0_48, %c0_49, %c0_50], %64 {strides = array<i32>} : memref<4x8x8xf32, #tpu.memory_space<vmem>>, vector<1x8x8xf32>,
      %cst_51 = arith.constant dense<0.000000e+00> : vector<8x8xf32>
      %65 = tpu.matmul %60, %61, %cst_51 {dimension_numbers = #tpu.dot_dimension_numbers<[0], [0], [1], [1], [0, 1, 1, 1], [], []>} : vector<8x8xf32>, vector<8x8xf32>, vector<8x8xf32> -> vector<8x8xf32>
      %c0_52 = arith.constant 0 : index
      %c0_53 = arith.constant 0 : index
      %66 = vector.load %arg9[%c0_52, %c0_53] : memref<32x32xf32, #tpu.memory_space<vmem>>, vector<8x32xf32>
      %cst_54 = arith.constant dense<0.000000e+00> : vector<8x32xf32>
      %67 = tpu.matmul %65, %66, %cst_54 {dimension_numbers = #tpu.dot_dimension_numbers<[1], [0], [0], [1], [0, 0, 1, 1], [], []>} : vector<8x8xf32>, vector<8x32xf32>, vector<8x32xf32> -> vector<8x32xf32>
      %c0_55 = arith.constant 0 : index
      %c0_56 = arith.constant 0 : index
      %68 = vector.load %arg15[%c0_55, %c0_56] : memref<32x32xf32, #tpu.memory_space<vmem>>, vector<8x32xf32>
      tpu.vector_store %arg15[%c0_55, %c0_56], %67 {strides = array<i32>} : memref<32x32xf32, #tpu.memory_space<vmem>>, vector<8x32xf32>,
      %69 = vector.extract_strided_slice %52 {offsets = [0, 8], sizes = [8, 8], strides = [1, 1]} : vector<8x32xf32> to vector<8x8xf32>
      %70 = vector.extract_strided_slice %59 {offsets = [0, 8], sizes = [8, 8], strides = [1, 1]} : vector<8x32xf32> to vector<8x8xf32>
      %c1_57 = arith.constant 1 : index
      %c0_58 = arith.constant 0 : index
      %c0_59 = arith.constant 0 : index
      %71 = vector.load %arg14[%c1_57, %c0_58, %c0_59] : memref<4x8x8xf32, #tpu.memory_space<vmem>>, vector<1x8x8xf32>
      %72 = vector.shape_cast %71 : vector<1x8x8xf32> to vector<8x8xf32>
      %73 = vector.shape_cast %69 : vector<8x8xf32> to vector<1x8x8xf32>
      tpu.vector_store %arg14[%c1_57, %c0_58, %c0_59], %73 {strides = array<i32>} : memref<4x8x8xf32, #tpu.memory_space<vmem>>, vector<1x8x8xf32>,
      %cst_60 = arith.constant dense<0.000000e+00> : vector<8x8xf32>
      %74 = tpu.matmul %69, %70, %cst_60 {dimension_numbers = #tpu.dot_dimension_numbers<[0], [0], [1], [1], [0, 1, 1, 1], [], []>} : vector<8x8xf32>, vector<8x8xf32>, vector<8x8xf32> -> vector<8x8xf32>
      %c8 = arith.constant 8 : index
      %c0_61 = arith.constant 0 : index
      %75 = vector.load %arg9[%c8, %c0_61] : memref<32x32xf32, #tpu.memory_space<vmem>>, vector<8x32xf32>
      %cst_62 = arith.constant dense<0.000000e+00> : vector<8x32xf32>
      %76 = tpu.matmul %74, %75, %cst_62 {dimension_numbers = #tpu.dot_dimension_numbers<[1], [0], [0], [1], [0, 0, 1, 1], [], []>} : vector<8x8xf32>, vector<8x32xf32>, vector<8x32xf32> -> vector<8x32xf32>
      %c8_63 = arith.constant 8 : index
      %c0_64 = arith.constant 0 : index
      %77 = vector.load %arg15[%c8_63, %c0_64] : memref<32x32xf32, #tpu.memory_space<vmem>>, vector<8x32xf32>
      tpu.vector_store %arg15[%c8_63, %c0_64], %76 {strides = array<i32>} : memref<32x32xf32, #tpu.memory_space<vmem>>, vector<8x32xf32>,
      %78 = vector.extract_strided_slice %52 {offsets = [0, 16], sizes = [8, 8], strides = [1, 1]} : vector<8x32xf32> to vector<8x8xf32>
      %79 = vector.extract_strided_slice %59 {offsets = [0, 16], sizes = [8, 8], strides = [1, 1]} : vector<8x32xf32> to vector<8x8xf32>
      %c2_65 = arith.constant 2 : index
      %c0_66 = arith.constant 0 : index
      %c0_67 = arith.constant 0 : index
      %80 = vector.load %arg14[%c2_65, %c0_66, %c0_67] : memref<4x8x8xf32, #tpu.memory_space<vmem>>, vector<1x8x8xf32>
      %81 = vector.shape_cast %80 : vector<1x8x8xf32> to vector<8x8xf32>
      %82 = vector.shape_cast %78 : vector<8x8xf32> to vector<1x8x8xf32>
      tpu.vector_store %arg14[%c2_65, %c0_66, %c0_67], %82 {strides = array<i32>} : memref<4x8x8xf32, #tpu.memory_space<vmem>>, vector<1x8x8xf32>,
      %cst_68 = arith.constant dense<0.000000e+00> : vector<8x8xf32>
      %83 = tpu.matmul %78, %79, %cst_68 {dimension_numbers = #tpu.dot_dimension_numbers<[0], [0], [1], [1], [0, 1, 1, 1], [], []>} : vector<8x8xf32>, vector<8x8xf32>, vector<8x8xf32> -> vector<8x8xf32>
      %c16 = arith.constant 16 : index
      %c0_69 = arith.constant 0 : index
      %84 = vector.load %arg9[%c16, %c0_69] : memref<32x32xf32, #tpu.memory_space<vmem>>, vector<8x32xf32>
      %cst_70 = arith.constant dense<0.000000e+00> : vector<8x32xf32>
      %85 = tpu.matmul %83, %84, %cst_70 {dimension_numbers = #tpu.dot_dimension_numbers<[1], [0], [0], [1], [0, 0, 1, 1], [], []>} : vector<8x8xf32>, vector<8x32xf32>, vector<8x32xf32> -> vector<8x32xf32>
      %c16_71 = arith.constant 16 : index
      %c0_72 = arith.constant 0 : index
      %86 = vector.load %arg15[%c16_71, %c0_72] : memref<32x32xf32, #tpu.memory_space<vmem>>, vector<8x32xf32>
      tpu.vector_store %arg15[%c16_71, %c0_72], %85 {strides = array<i32>} : memref<32x32xf32, #tpu.memory_space<vmem>>, vector<8x32xf32>,
      %87 = vector.extract_strided_slice %52 {offsets = [0, 24], sizes = [8, 8], strides = [1, 1]} : vector<8x32xf32> to vector<8x8xf32>
      %88 = vector.extract_strided_slice %59 {offsets = [0, 24], sizes = [8, 8], strides = [1, 1]} : vector<8x32xf32> to vector<8x8xf32>
      %c3_73 = arith.constant 3 : index
      %c0_74 = arith.constant 0 : index
      %c0_75 = arith.constant 0 : index
      %89 = vector.load %arg14[%c3_73, %c0_74, %c0_75] : memref<4x8x8xf32, #tpu.memory_space<vmem>>, vector<1x8x8xf32>
      %90 = vector.shape_cast %89 : vector<1x8x8xf32> to vector<8x8xf32>
      %91 = vector.shape_cast %87 : vector<8x8xf32> to vector<1x8x8xf32>
      tpu.vector_store %arg14[%c3_73, %c0_74, %c0_75], %91 {strides = array<i32>} : memref<4x8x8xf32, #tpu.memory_space<vmem>>, vector<1x8x8xf32>,
      %cst_76 = arith.constant dense<0.000000e+00> : vector<8x8xf32>
      %92 = tpu.matmul %87, %88, %cst_76 {dimension_numbers = #tpu.dot_dimension_numbers<[0], [0], [1], [1], [0, 1, 1, 1], [], []>} : vector<8x8xf32>, vector<8x8xf32>, vector<8x8xf32> -> vector<8x8xf32>
      %c24 = arith.constant 24 : index
      %c0_77 = arith.constant 0 : index
      %93 = vector.load %arg9[%c24, %c0_77] : memref<32x32xf32, #tpu.memory_space<vmem>>, vector<8x32xf32>
      %cst_78 = arith.constant dense<0.000000e+00> : vector<8x32xf32>
      %94 = tpu.matmul %92, %93, %cst_78 {dimension_numbers = #tpu.dot_dimension_numbers<[1], [0], [0], [1], [0, 0, 1, 1], [], []>} : vector<8x8xf32>, vector<8x32xf32>, vector<8x32xf32> -> vector<8x32xf32>
      %c24_79 = arith.constant 24 : index
      %c0_80 = arith.constant 0 : index
      %95 = vector.load %arg15[%c24_79, %c0_80] : memref<32x32xf32, #tpu.memory_space<vmem>>, vector<8x32xf32>
      tpu.vector_store %arg15[%c24_79, %c0_80], %94 {strides = array<i32>} : memref<32x32xf32, #tpu.memory_space<vmem>>, vector<8x32xf32>,
    } else {
    }
    %c0 = arith.constant 0 : index
    %c0_1 = arith.constant 0 : index
    %c0_2 = arith.constant 0 : index
    %3 = vector.load %arg2[%c0, %c0_1, %c0_2] : memref<1x8x32xf32, #tpu.memory_space<vmem>>, vector<1x8x32xf32>
    %4 = vector.shape_cast %3 : vector<1x8x32xf32> to vector<8x32xf32>
    %c0_3 = arith.constant 0 : index
    %c0_4 = arith.constant 0 : index
    %5 = vector.load %arg3[%c0_3, %c0_4] : memref<32x32xf32, #tpu.memory_space<vmem>>, vector<32x32xf32>
    %cst = arith.constant dense<0.000000e+00> : vector<8x32xf32>
    %6 = tpu.matmul %4, %5, %cst {dimension_numbers = #tpu.dot_dimension_numbers<[1], [0], [0], [1], [0, 0, 1, 1], [], []>} : vector<8x32xf32>, vector<32x32xf32>, vector<8x32xf32> -> vector<8x32xf32>
    %c0_5 = arith.constant 0 : index
    %c0_6 = arith.constant 0 : index
    %7 = vector.load %arg4[%c0_5, %c0_6] : memref<1x32xf32, #tpu.memory_space<vmem>>, vector<1x32xf32>
    %8 = vector.shape_cast %7 : vector<1x32xf32> to vector<32xf32>
    %9 = vector.shape_cast %8 : vector<32xf32> to vector<1x32xf32>
    %10 = vector.broadcast %9 : vector<1x32xf32> to vector<8x32xf32>
    %11 = arith.addf %6, %10 : vector<8x32xf32>
    %12 = vector.extract_strided_slice %11 {offsets = [0, 0], sizes = [8, 8], strides = [1, 1]} : vector<8x32xf32> to vector<8x8xf32>
    %c0_7 = arith.constant 0 : index
    %c0_8 = arith.constant 0 : index
    %c0_9 = arith.constant 0 : index
    %13 = vector.load %arg13[%c0_7, %c0_8, %c0_9] : memref<4x8x8xf32, #tpu.memory_space<vmem>>, vector<1x8x8xf32>
    %14 = vector.shape_cast %13 : vector<1x8x8xf32> to vector<8x8xf32>
    %15 = vector.shape_cast %12 : vector<8x8xf32> to vector<1x8x8xf32>
    tpu.vector_store %arg13[%c0_7, %c0_8, %c0_9], %15 {strides = array<i32>} : memref<4x8x8xf32, #tpu.memory_space<vmem>>, vector<1x8x8xf32>,
    %16 = vector.extract_strided_slice %11 {offsets = [0, 8], sizes = [8, 8], strides = [1, 1]} : vector<8x32xf32> to vector<8x8xf32>
    %c1 = arith.constant 1 : index
    %c0_10 = arith.constant 0 : index
    %c0_11 = arith.constant 0 : index
    %17 = vector.load %arg13[%c1, %c0_10, %c0_11] : memref<4x8x8xf32, #tpu.memory_space<vmem>>, vector<1x8x8xf32>
    %18 = vector.shape_cast %17 : vector<1x8x8xf32> to vector<8x8xf32>
    %19 = vector.shape_cast %16 : vector<8x8xf32> to vector<1x8x8xf32>
    tpu.vector_store %arg13[%c1, %c0_10, %c0_11], %19 {strides = array<i32>} : memref<4x8x8xf32, #tpu.memory_space<vmem>>, vector<1x8x8xf32>,
    %20 = vector.extract_strided_slice %11 {offsets = [0, 16], sizes = [8, 8], strides = [1, 1]} : vector<8x32xf32> to vector<8x8xf32>
    %c2 = arith.constant 2 : index
    %c0_12 = arith.constant 0 : index
    %c0_13 = arith.constant 0 : index
    %21 = vector.load %arg13[%c2, %c0_12, %c0_13] : memref<4x8x8xf32, #tpu.memory_space<vmem>>, vector<1x8x8xf32>
    %22 = vector.shape_cast %21 : vector<1x8x8xf32> to vector<8x8xf32>
    %23 = vector.shape_cast %20 : vector<8x8xf32> to vector<1x8x8xf32>
    tpu.vector_store %arg13[%c2, %c0_12, %c0_13], %23 {strides = array<i32>} : memref<4x8x8xf32, #tpu.memory_space<vmem>>, vector<1x8x8xf32>,
    %24 = vector.extract_strided_slice %11 {offsets = [0, 24], sizes = [8, 8], strides = [1, 1]} : vector<8x32xf32> to vector<8x8xf32>
    %c3 = arith.constant 3 : index
    %c0_14 = arith.constant 0 : index
    %c0_15 = arith.constant 0 : index
    %25 = vector.load %arg13[%c3, %c0_14, %c0_15] : memref<4x8x8xf32, #tpu.memory_space<vmem>>, vector<1x8x8xf32>
    %26 = vector.shape_cast %25 : vector<1x8x8xf32> to vector<8x8xf32>
    %27 = vector.shape_cast %24 : vector<8x8xf32> to vector<1x8x8xf32>
    tpu.vector_store %arg13[%c3, %c0_14, %c0_15], %27 {strides = array<i32>} : memref<4x8x8xf32, #tpu.memory_space<vmem>>, vector<1x8x8xf32>,
    %c0_16 = arith.constant 0 : index
    %c0_17 = arith.constant 0 : index
    %c0_18 = arith.constant 0 : index
    %28 = vector.load %arg13[%c0_16, %c0_17, %c0_18] : memref<4x8x8xf32, #tpu.memory_space<vmem>>, vector<4x8x8xf32>
    %c0_19 = arith.constant 0 : index
    %c0_20 = arith.constant 0 : index
    %c0_21 = arith.constant 0 : index
    %29 = vector.load %arg14[%c0_19, %c0_20, %c0_21] : memref<4x8x8xf32, #tpu.memory_space<vmem>>, vector<4x8x8xf32>
    "tpu.trace_start"() <{level = 10 : i32, message = "hqd,hkd->hqk"}> : () -> ()
    %cst_22 = arith.constant dense<0.000000e+00> : vector<4x8x8xf32>
    %30 = tpu.matmul %28, %29, %cst_22 {dimension_numbers = #tpu.dot_dimension_numbers<[2], [2], [1], [1], [0, 0, 0, 1, 1, 1], [0], [0]>} : vector<4x8x8xf32>, vector<4x8x8xf32>, vector<4x8x8xf32> -> vector<4x8x8xf32>
    "tpu.trace_stop"() : () -> ()
    %c0_23 = arith.constant 0 : index
    %c0_24 = arith.constant 0 : index
    %c0_25 = arith.constant 0 : index
    %c0_26 = arith.constant 0 : index
    %31 = vector.load %arg12[%c0_23, %c0_24, %c0_25, %c0_26] : memref<1x4x8x8xf32, #tpu.memory_space<vmem>>, vector<1x4x8x8xf32>
    %32 = vector.shape_cast %31 : vector<1x4x8x8xf32> to vector<4x8x8xf32>
    %33 = vector.shape_cast %30 : vector<4x8x8xf32> to vector<1x4x8x8xf32>
    tpu.vector_store %arg12[%c0_23, %c0_24, %c0_25, %c0_26], %33 {strides = array<i32>} : memref<1x4x8x8xf32, #tpu.memory_space<vmem>>, vector<1x4x8x8xf32>,
    %c0_27 = arith.constant 0 : index
    %c0_28 = arith.constant 0 : index
    %34 = vector.load %arg15[%c0_27, %c0_28] : memref<32x32xf32, #tpu.memory_space<vmem>>, vector<32x32xf32>
    %cst_29 = arith.constant dense<0.000000e+00> : vector<8x32xf32>
    %35 = tpu.matmul %11, %34, %cst_29 {dimension_numbers = #tpu.dot_dimension_numbers<[1], [0], [0], [1], [0, 0, 1, 1], [], []>} : vector<8x32xf32>, vector<32x32xf32>, vector<8x32xf32> -> vector<8x32xf32>
    %c0_30 = arith.constant 0 : index
    %c0_31 = arith.constant 0 : index
    %36 = vector.load %arg10[%c0_30, %c0_31] : memref<1x32xf32, #tpu.memory_space<vmem>>, vector<1x32xf32>
    %37 = vector.shape_cast %36 : vector<1x32xf32> to vector<32xf32>
    %38 = vector.shape_cast %37 : vector<32xf32> to vector<1x32xf32>
    %39 = vector.broadcast %38 : vector<1x32xf32> to vector<8x32xf32>
    %40 = arith.addf %35, %39 : vector<8x32xf32>
    %c0_32 = arith.constant 0 : index
    %c0_33 = arith.constant 0 : index
    %c0_34 = arith.constant 0 : index
    %41 = vector.load %arg11[%c0_32, %c0_33, %c0_34] : memref<1x8x32xf32, #tpu.memory_space<vmem>>, vector<1x8x32xf32>
    %42 = vector.shape_cast %41 : vector<1x8x32xf32> to vector<8x32xf32>
    %43 = vector.shape_cast %40 : vector<8x32xf32> to vector<1x8x32xf32>
    tpu.vector_store %arg11[%c0_32, %c0_33, %c0_34], %43 {strides = array<i32>} : memref<1x8x32xf32, #tpu.memory_space<vmem>>, vector<1x8x32xf32>,
    return
  }
  func.func @transform_0(%arg0: i32, %arg1: i32) -> (i32, i32, i32) {
    %c0_i32 = arith.constant 0 : i32
    %c0_i32_0 = arith.constant 0 : i32
    %c0_i32_1 = arith.constant 0 : i32
    return %arg0, %c0_i32, %c0_i32_0 : i32, i32, i32
  }
  func.func @transform_1(%arg0: i32, %arg1: i32) -> (i32, i32) {
    %c0_i32 = arith.constant 0 : i32
    %c0_i32_0 = arith.constant 0 : i32
    %c0_i32_1 = arith.constant 0 : i32
    return %c0_i32, %c0_i32_0 : i32, i32
  }
  func.func @transform_2(%arg0: i32, %arg1: i32) -> (i32, i32) {
    %c0_i32 = arith.constant 0 : i32
    %c0_i32_0 = arith.constant 0 : i32
    %c0_i32_1 = arith.constant 0 : i32
    return %c0_i32, %c0_i32_0 : i32, i32
  }
  func.func @transform_3(%arg0: i32, %arg1: i32) -> (i32, i32) {
    %c0_i32 = arith.constant 0 : i32
    %c0_i32_0 = arith.constant 0 : i32
    %c0_i32_1 = arith.constant 0 : i32
    return %c0_i32, %c0_i32_0 : i32, i32
  }
  func.func @transform_4(%arg0: i32, %arg1: i32) -> (i32, i32) {
    %c0_i32 = arith.constant 0 : i32
    %c0_i32_0 = arith.constant 0 : i32
    %c0_i32_1 = arith.constant 0 : i32
    return %c0_i32, %c0_i32_0 : i32, i32
  }
  func.func @transform_5(%arg0: i32, %arg1: i32) -> (i32, i32) {
    %c0_i32 = arith.constant 0 : i32
    %c0_i32_0 = arith.constant 0 : i32
    %c0_i32_1 = arith.constant 0 : i32
    return %c0_i32, %c0_i32_0 : i32, i32
  }
  func.func @transform_6(%arg0: i32, %arg1: i32) -> (i32, i32) {
    %c0_i32 = arith.constant 0 : i32
    %c0_i32_0 = arith.constant 0 : i32
    %c0_i32_1 = arith.constant 0 : i32
    return %c0_i32, %c0_i32_0 : i32, i32
  }
  func.func @transform_7(%arg0: i32, %arg1: i32) -> (i32, i32) {
    %c0_i32 = arith.constant 0 : i32
    %c0_i32_0 = arith.constant 0 : i32
    %c0_i32_1 = arith.constant 0 : i32
    return %c0_i32, %c0_i32_0 : i32, i32
  }
  func.func @transform_8(%arg0: i32, %arg1: i32) -> (i32, i32) {
    %c0_i32 = arith.constant 0 : i32
    %c0_i32_0 = arith.constant 0 : i32
    %c0_i32_1 = arith.constant 0 : i32
    return %c0_i32, %c0_i32_0 : i32, i32
  }
  func.func @transform_9(%arg0: i32, %arg1: i32) -> (i32, i32, i32) {
    %c0_i32 = arith.constant 0 : i32
    %c0_i32_0 = arith.constant 0 : i32
    return %arg0, %arg1, %c0_i32 : i32, i32, i32
  }
  func.func @transform_10(%arg0: i32, %arg1: i32) -> (i32, i32, i32, i32) {
    %c0_i32 = arith.constant 0 : i32
    %c0_i32_0 = arith.constant 0 : i32
    %c0_i32_1 = arith.constant 0 : i32
    return %arg0, %c0_i32, %arg1, %c0_i32_0 : i32, i32, i32, i32
  }
}

</mosaic_0001>

<bundles_post_ra>
// kernel: tpu_custom_call.1
= control target key start
LH: loop header
LB: loop body
LE: loop exit
PB: predicated region body
PF: predicated region fallthrough
CT: control target
= control target key end

     0   :  { %s2023_s0 = inlined_call_operand.hbm [shape: f32[2,8,32], index: 0, kind: input, shape index: {}]   ;;  %s2024_s1 = inlined_call_operand.hbm [shape: f32[32,32], index: 1, kind: input, shape index: {}]   ;;  %s2025_s2 = inlined_call_operand.vmem [shape: f32[1,32], index: 2, kind: input, shape index: {}]   ;;  %s2026_s3 = inlined_call_operand.hbm [shape: f32[32,32], index: 3, kind: input, shape index: {}]   ;;  %s2027_s4 = inlined_call_operand.vmem [shape: f32[1,32], index: 4, kind: input, shape index: {}]   ;;  %s2028_s5 = inlined_call_operand.hbm [shape: f32[32,32], index: 5, kind: input, shape index: {}]   ;;  %s2029_s6 = inlined_call_operand.vmem [shape: f32[1,32], index: 6, kind: input, shape index: {}]   ;;  %s2030_s7 = inlined_call_operand.hbm [shape: f32[32,32], index: 7, kind: input, shape index: {}]   ;;  %s2031_s8 = inlined_call_operand.vmem [shape: f32[1,32], index: 8, kind: input, shape index: {}]   ;;  %s2032_s9 = inlined_call_operand.hbm [shape: f32[2,8,32], index: 9, kind: output, shape index: {0}]   ;;  %s2033_s10 = inlined_call_operand.hbm [shape: f32[2,4,8,8], index: 10, kind: output, shape index: {1}]  }
   0x1   :  { %2036 = sst [smem:[#allocation22_spill]] %s2023_s0 }
   0x2   :  { %2037 = sst [smem:[#allocation23_spill]] %s2024_s1 }
   0x3   :  { %2038 = sst [smem:[#allocation24_spill]] %s2025_s2 }
   0x4   :  { %2039 = sst [smem:[#allocation25_spill]] %s2026_s3 }
   0x5   :  { %2040 = sst [smem:[#allocation26_spill]] %s2028_s5 }
   0x6   :  { %2041 = sst [smem:[#allocation27_spill]] %s2030_s7 }
   0x7   :  { %16 = vsyncpa [#allocation6], 0 }
   0x8   :  { %18 = vsyncpa [#allocation6 + $0x1], 0 }
   0x9   :  { %19 = vsyncpa [#allocation9], 0 }
   0xa   :  { %20 = vsyncpa [#allocation12], 0 }
   0xb   :  { %21 = vsyncpa [#allocation7], 0 }
   0xc   :  { %23 = vsyncpa [#allocation7 + $0x1], 0 }
   0xd   :  { %24 = vsyncpa [#allocation16], 0 }
   0xe   :  { %26 = vsyncpa [#allocation16 + $0x1], 0  ;;  %s1779_s13 = smov 0   ;;  %s1781_s14 = smov 0  }
   0xf   :  { %s1783_s15 = smov 0   ;;  %s1785_s16 = smov 0  }
  0x10   :  { %s1787_s17 = smov 0   ;;  %s1789_s18 = smov 0  }
  0x11 LB: > { %s2034_s19 = sadd.s32 4294967295, %s1711_s18   ;;  %p1275_p0 = scmp.ge.s32.totalorder %s1711_s18, 1  ;;  %s1711_s18 = sphi %s1789_s18, %s32_s18   ;;  %s1707_s17 = sphi %s1787_s17, %s2060_s17   ;;  %s1703_s16 = sphi %s1785_s16, %s2059_s16   ;;  %s1699_s15 = sphi %s1783_s15, %s2058_s15   ;;  %s1695_s14 = sphi %s1781_s14, %s2057_s14   ;;  %s1691_s13 = sphi %s1779_s13, %s2056_s13  }
  0x12   : > { %p1813_p1 = scmp.eq.s32.totalorder %s2034_s19, 0  ;;  %p299_p2 = scmp.lt.s32.totalorder %s1711_s18, 3 }
  0x13   : > { %s2043_s1 = sld [smem:[#allocation23_spill]]  ;;  %s1713_s25 = smov [#allocation8]  }
  0x14   : > { %p1821_p3 = pnand %p1275_p0, %p299_p2  ;;  %s312_s26 = sshll.u32 %s1713_s25, 4  ;;  %s313_s26 = int_to_ptr.vmem [resolvable:$true] %s312_s26 }
  0x15   : > { %p1280_p6 = scmp.ge.s32.totalorder %s1711_s18, 2  ;;  %s2046_s5 = sld [smem:[#allocation26_spill]] }
  0x16   : > { %p1341_p4 = pneg %p1821_p3  ;;  %s1714_s11 = smov 128  }
  0x17   : > { %s1715_s12 = smov 8   ;;  %s1716_s21 = smov [#allocation11]  }
  0x18   : > { %p1829_p5 = pnand %p1341_p4, %p1813_p1  ;;  %s346_s22 = sshll.u32 %s1716_s21, 4  ;;  %s347_s22 = int_to_ptr.vmem [resolvable:$true] %s346_s22 }
  0x19   : > { %s310_s23 = sshll.u32 %s2043_s1, 4  ;;  %s2047_s3 = sld [smem:[#allocation25_spill]]  ;;  %s311_s23 = int_to_ptr.hbm [resolvable:$true] %s310_s23 }
  0x1a   : > { %1344 = dma.hbm_to_vmem [thread:$0]  (!%p1829_p5), %s311_s23, 512, %s313_s26, [#allocation9], %s1714_s11, %s1714_s11, %s1715_s12  }
  0x1b   : > { %s344_s30 = sshll.u32 %s2046_s5, 4  ;;  %s2048_s7 = sld [smem:[#allocation27_spill]]  ;;  %s345_s30 = int_to_ptr.hbm [resolvable:$true] %s344_s30 }
  0x1c   : > { %1350 = dma.hbm_to_vmem [thread:$0]  (!%p1829_p5), %s345_s30, 512, %s347_s22, [#allocation12], %s1714_s11, %s1714_s11, %s1715_s12  }
  0x1d   : > { %s1717_s26 = smov [#allocation10]   ;;  %s1718_s19 = smov [#allocation13]  }
  0x1e   : > { %s329_s21 = sshll.u32 %s1717_s26, 4  ;;  %s363_s25 = sshll.u32 %s1718_s19, 4  ;;  %s330_s21 = int_to_ptr.vmem [resolvable:$true] %s329_s21  ;;  %s364_s25 = int_to_ptr.vmem [resolvable:$true] %s363_s25 }
  0x1f   : > { %s327_s1 = sshll.u32 %s2047_s3, 4  ;;  %s44_s30 = sadd.s32 1, %s1707_s17  ;;  %s328_s1 = int_to_ptr.hbm [resolvable:$true] %s327_s1 }
  0x20   : > { %1347 = dma.hbm_to_vmem [thread:$0]  (!%p1829_p5), %s328_s1, 512, %s330_s21, [#allocation9], %s1714_s11, %s1714_s11, %s1715_s12  }
  0x21   : > { %s361_s23 = sshll.u32 %s2048_s7, 4  ;;  %s1274_s22 = sadd.s32 4294967294, %s1711_s18   ;;  %s362_s23 = int_to_ptr.hbm [resolvable:$true] %s361_s23 }
  0x22   : > { %1353 = dma.hbm_to_vmem [thread:$0]  (!%p1829_p5), %s362_s23, 512, %s364_s25, [#allocation12], %s1714_s11, %s1714_s11, %s1715_s12  }
  0x23   : > { %p46_p7 = scmp.ge.s32.totalorder %s44_s30, 2  ;;  %s51_s28 = sadd.s32 1, %s1699_s15 }
  0x24   : > { %p58_p8 = scmp.ne.s32.totalorder %s1699_s15, %s1695_s14  ;;  %p59_p9 = scmp.eq.s32.totalorder %s1711_s18, 0 }
  0x25   : > { %s2062_s30 = smov (%p46_p7, %s44_s30), 0  ;;  %p64_p10 = scmp.ne.s32.totalorder %s1695_s14, %s1691_s13 }
  0x26   : > { %s48_s1 = ssub.s32 %s1707_s17, %s2062_s30  ;;  %s2049_s29 = sadd.s32 4294967295, %s1711_s18  }
  0x27   : > { %p258_p11 = scmp.eq.s32.totalorder %s2049_s29, 1  ;;  %p49_p12 = scmp.eq.s32.totalorder %s48_s1, 0 }
  0x28   : > { %p1867_p13 = por %p1813_p1, %p64_p10  ;;  %p264_p2 = scmp.eq.s32.totalorder %s1274_s22, 1 }
  0x29   : > { %p1871_p0 = por %p258_p11, %p58_p8  ;;  %p60_p4 = por %p59_p9, %p58_p8 }
  0x2a   : > { %s1876_s12 = scalar_select %p49_p12, %s1699_s15, %s51_s28  }
  0x2b   : > { %p1878_p5 = por %p264_p2, %p64_p10  ;;  %s380_s26 = sand.u32 1, %s1699_s15  }
  0x2c   : > { %s1282_s21 = sshll.u32 %s1707_s17, 3  ;;  %p1369_p7 = scmp.lt.s32.totalorder %s1711_s18, 2 }
  0x2d   : > { %s1281_s19 = sshll.u32 %s380_s26, 3  ;;  %s2053_s0 = sld [smem:[#allocation22_spill]] }
  0x2e   : > { %s384_s5 = scalar_lea.vmem [#allocation5], %s1281_s19  ;;  %p1355_p11 = pnand %p1369_p7, %p60_p4 }
  0x2f   : > { %s392_s7 = sshll.u32 %s384_s5, 4  ;;  %s381_s22 = scalar_lea.sflag [#allocation6], %s380_s26  ;;  %s393_s7 = int_to_ptr.vmem [resolvable:$true] %s392_s7 }
  0x30   : > { %s1891_s28 = sand.u32 (!%p1821_p3), 1, %s1695_s14  }
  0x31   : > { %401 = sbr.rel (%p1821_p3) target bundleno = 893 (0x37d), region = 56  ;;  %s2035_s25 = sshll.u32 (!%p1821_p3), %s1891_s28, 3 }
  0x32   : > { %s407_s19 = scalar_lea.vmem (!%p1821_p3), [#allocation5], %s2035_s25 }
  0x33   : > { %s388_s29 = scalar_lea.hbm %s2053_s0, %s1282_s21  ;;  %s404_s21 = scalar_lea.sflag (!%p1821_p3), [#allocation6], %s1891_s28 }
  0x34   : > { %s390_s3 = sshll.u32 %s388_s29, 4  ;;  %s391_s3 = int_to_ptr.hbm [resolvable:$true] %s390_s3 }
  0x35   : > { %1357 = dma.hbm_to_vmem [thread:$0]  (!%p1355_p11), %s391_s3, 128, %s393_s7, %s381_s22  }
  0x36   : > { %1670 = dma.done.wait (%p1867_p13), %s404_s21, 128  }
  0x37   : > { %1672 = vsyncadd (%p1867_p13), %s404_s21, 4294967168 }
  0x38   : > { %1674 = dma.done.wait (%p1813_p1), [#allocation9], 1024  }
  0x39   : > { %1676 = vsyncadd (%p1813_p1), [#allocation9], 4294966272 }
  0x3a   : > { %1678 = dma.done.wait (%p1813_p1), [#allocation12], 1024  }
  0x3b   : > { %1680 = vsyncadd (%p1813_p1), [#allocation12], 4294966272  ;;  %v478_v0 = vld [vmem:[#allocation10 + $0x18] sm:$0xff]  ;;  %v477_v2 = vld [vmem:[#allocation10 + $0x10] sm:$0xff]  ;;  %vm483_vm0 = vcmask 261120   ;;  %vm535_vm1 = vcmask 64512  }
  0x3c   : > { %v510_v1 = vld [vmem:[#allocation11 + $0x18] sm:$0xff]  ;;  %499 = vmatpush.msra.mxu0 %v478_v0  ;;  %v509_v3 = vld [vmem:[#allocation11 + $0x10] sm:$0xff]  ;;  %v476_v4 = vld [vmem:[#allocation10 + $0x8] sm:$0xff]  ;;  %s1719_s24 = smov 104   ;;  %s1720_s27 = smov 120  }
  0x3d   : > { %527 = vmatpush.msra.mxu1 %v510_v1  ;;  %v508_v5 = vld [vmem:[#allocation11 + $0x8] sm:$0xff]  ;;  %v475_v6 = vld [vmem:[#allocation10] sm:$0xff]  ;;  %v474_v8 = vld [vmem:[%s407_s19] sm:$0xff]  ;;  %s1721_s26 = smov 112   ;;  %s2054_s2 = sld [smem:[#allocation24_spill]] }
  0x3e   : > { %500 = vmatpush.msra.mxu0 %v477_v2  ;;  %v507_v7 = vld [vmem:[#allocation11] sm:$0xff]  ;;  %v770_v9 = vld [vmem:[#allocation13 + $0x10] sm:$0xff]  ;;  %v887_v22 = vld [vmem:[#allocation8 + $0x18] sm:$0xff]  ;;  %s1290_s22 = sshll.u32 %s1891_s28, 5  ;;  %s1318_s19 = sshll.u32 %s1703_s16, 5 }
  0x3f   : > { %528 = vmatpush.msra.mxu1 %v509_v3  ;;  %v1435_v10 = vld [vmem:[%s2027_s4] ss:$0 sm:$0xff]  ;;  %v885_v24 = vld [vmem:[#allocation8 + $0x8] sm:$0xff]  ;;  %v884_v27 = vld [vmem:[#allocation8] sm:$0xff]  ;;  %s469_s21 = scalar_lea.vmem [#allocation15], %s1290_s22  ;;  %s1114_s7 = scalar_lea.hbm %s2033_s10, %s1318_s19 }
  0x40   : > { %501 = vmatpush.msra.mxu0 %v476_v4  ;;  %v1436_v11 = vld [vmem:[%s2029_s6] ss:$0 sm:$0xff]  ;;  %v592_v33 = vld [vmem:[#allocation13] sm:$0xff]  ;;  %v682_v34 = vld [vmem:[#allocation13 + $0x8] sm:$0xff]  ;;  %s1115_s20 = sshll.u32 %s469_s21, 4  ;;  %s1609_s3 = scalar_lea.hbm %s2033_s10, 64  ;;  %s1116_s20 = int_to_ptr.vmem [resolvable:$true] %s1115_s20 }
  0x41   : > { %529 = vmatpush.msra.mxu1 %v508_v5  ;;  %v886_v23 = vld [vmem:[#allocation8 + $0x10] sm:$0xff]  ;;  %611 = vmatpush.msra.mxu3 %v592_v33  ;;  %v858_v36 = vld [vmem:[#allocation13 + $0x18] sm:$0xff] }
  0x42   : > { %502 = vmatpush.msra.mxu0 %v475_v6 }
  0x43   : > { %530 = vmatpush.msra.mxu1 %v507_v7  ;;  %1291 = vmatmul.msk.f32.vlgmr.msra.gmra.mxu0 %vm483_vm0, %v474_v8  ;;  %v1437_v38 = vld [vmem:[%s2054_s2] ss:$0 sm:$0xff] }
  0x44   : > { %1292 = vmatmul.msk.f32.vlgmr.msra.gmra.mxu1 %vm483_vm0, %v474_v8  ;;  %701 = vmatpush.msrb.mxu3 %v682_v34 }
  0x45   : > { %789 = vmatpush.msrb.mxu1 %v770_v9 }
  0xc0   : > { %v504_v12 = vpop.f32.mrf.mxu0 }
  0xc1   : > { %v532_v13 = vpop.f32.mrf.mxu1  ;;  %v505_v14 = vadd.f32 %v1435_v10, %v504_v12 }
  0xc2   : > { %v533_v15 = vadd.f32 %v1436_v11, %v532_v13 }
  0xc3   : > { %536 = vst.msk [vmem:[#allocation3] sm:$0xff] %vm535_vm1, %v505_v14  ;;  %618 = vrot.lane.b32.xlu0 %v505_v14, %s1720_s27 }
  0xc4   : > { %832 = vrot.lane.b32.xlu2 %v533_v15, %s1719_s24  ;;  %656 = vrot.lane.b32.xlu1 %v533_v15, %s1720_s27 }
  0xc5   : > { %587 = vmatpush.msra.mxu2 %v533_v15 }
  0xca   : > { %v938_v16 = vld [vmem:[#allocation3] sm:$0xff] }
  0xcb   : > { %1302 = vmatpush.xpose.msk.msra.mxu1 %vm535_vm1, %v938_v16  ;;  %795 = vrot.lane.b32.xlu0 %v505_v14, %s1719_s24 }
  0xcc   : > { %707 = vrot.lane.b32.xlu1 %v505_v14, %s1721_s26 }
  0xd3   : > { %744 = vrot.lane.b32.xlu0 %v533_v15, %s1721_s26 }
  0xea   : > { %537 = vxpose.xlu2.b32.start.end [1/1] (short) (narrow) %v505_v14, 8 }
 0x11e   : > { %v833_v25 = vpop.permute.xlu2 %832 }
 0x135   : > { %v619_v18 = vpop.permute.xlu0 %618 }
 0x136   : > { %v657_v17 = vpop.permute.xlu1 %656  ;;  %622 = vst.msk [vmem:[#allocation3 + $0x8] sm:$0xff] %vm535_vm1, %v619_v18  ;;  %623 = vxpose.xlu1.b32.start.end [1/1] (short) (narrow) %v619_v18, 8 }
 0x137   : > { %677 = vmatpush.msrb.mxu2 %v657_v17 }
 0x13d   : > { %v796_v20 = vpop.permute.xlu0 %795  ;;  %v939_v31 = vld [vmem:[#allocation3 + $0x8] sm:$0xff] }
 0x13e   : > { %v708_v19 = vpop.permute.xlu1 %707  ;;  %799 = vst.msk [vmem:[#allocation3 + $0x18] sm:$0xff] %vm535_vm1, %v796_v20  ;;  %800 = vxpose.xlu0.b32.start.end [1/1] (short) (narrow) %v796_v20, 8 }
 0x13f   : > { %711 = vst.msk [vmem:[#allocation3 + $0x10] sm:$0xff] %vm535_vm1, %v708_v19  ;;  %712 = vxpose.xlu2.b32.start.end [1/1] (short) (narrow) %v708_v19, 8 }
 0x145   : > { %v745_v21 = vpop.permute.xlu0 %744  ;;  %v941_v29 = vld [vmem:[#allocation3 + $0x18] sm:$0xff] }
 0x146   : > { %765 = vmatpush.msrb.mxu0 %v745_v21  ;;  %v940_v42 = vld [vmem:[#allocation3 + $0x10] sm:$0xff] }
 0x148   : > { %908 = vmatpush.msra.mxu0 %v887_v22 }
 0x14a   : > { %909 = vmatpush.msra.mxu0 %v886_v23 }
 0x14c   : > { %910 = vmatpush.msra.mxu0 %v885_v24 }
 0x14e   : > { %911 = vmatpush.msra.mxu0 %v884_v27 }
 0x183   : > { %v553_v26 = vpop.trf.xlu2 }
 0x184   : > { %1293 = vmatmul.msk.f32.vlgmr.msra.gmra.mxu2 %vm535_vm1, %v553_v26 }
 0x185   : > { %853 = vmatpush.msra.mxu2 %v833_v25 }
 0x1d8   : > { %v728_v28 = vpop.trf.xlu2 }
 0x1d9   : > { %1297 = vmatmul.msk.f32.vlgmr.msrb.gmra.mxu0 %vm535_vm1, %v728_v28 }
 0x1da   : > { %1308 = vmatpush.xpose.msk.msrb.mxu0 %vm535_vm1, %v941_v29  ;;  %v639_v30 = vpop.trf.xlu1 }
 0x1db   : > { %1295 = vmatmul.msk.f32.vlgmr.msrb.gmra.mxu2 %vm535_vm1, %v639_v30 }
 0x1dc   : > { %1304 = vmatpush.xpose.msk.msrb.mxu2 %vm535_vm1, %v939_v31 }
 0x1e1   : > { %1301 = vmatmul.msk.f32.vlgmr.msra.gmra.mxu0 %vm483_vm0, %v474_v8 }
 0x1e2   : > { %v816_v32 = vpop.trf.xlu0 }
 0x1e3   : > { %1299 = vmatmul.msk.f32.vlgmr.msra.gmra.mxu2 %vm535_vm1, %v816_v32 }
 0x207   : > { %v589_v35 = vpop.f32.mrf.mxu2 }
 0x208   : > { %1294 = vmatmul.msk.f32.vlgmr.msra.gmra.mxu3 %vm535_vm1, %v589_v35 }
 0x209   : > { %877 = vmatpush.msra.mxu3 %v858_v36 }
 0x256   : > { %v767_v37 = vpop.f32.mrf.mxu0 }
 0x257   : > { %1298 = vmatmul.msk.f32.vlgmr.msrb.gmra.mxu1 %vm535_vm1, %v767_v37 }
 0x25e   : > { %v913_v39 = vpop.f32.mrf.mxu0  ;;  %v679_v41 = vpop.f32.mrf.mxu2 }
 0x25f   : > { %v914_v40 = vadd.f32 %v1437_v38, %v913_v39  ;;  %1296 = vmatmul.msk.f32.vlgmr.msrb.gmra.mxu3 %vm535_vm1, %v679_v41 }
 0x260   : > { %1306 = vmatpush.xpose.msk.msrb.mxu3 %vm535_vm1, %v940_v42 }
 0x261   : > { %917 = vst.msk [vmem:[#allocation2] sm:$0xff] %vm535_vm1, %v914_v40  ;;  %929 = vrot.lane.b32.xlu1 %v914_v40, %s1719_s24  ;;  %924 = vrot.lane.b32.xlu0 %v914_v40, %s1721_s26  ;;  %s1117_s24 = sshll.u32 %s1114_s7, 4  ;;  %s1118_s24 = int_to_ptr.hbm [resolvable:$true] %s1117_s24 }
 0x262   : > { %919 = vrot.lane.b32.xlu2 %v914_v40, %s1720_s27  ;;  %s1087_s27 = scalar_lea.sflag [#allocation16], %s1891_s28  ;;  %s1603_s26 = sshra.s32 %s1118_s24, 4  ;;  %s1604_s26 = int_to_ptr.hbm [resolvable:$true] %s1603_s26 }
 0x263   : > { %s1605_s1 = scalar_lea.hbm %s1604_s26, 32  ;;  %p1610_p9 = scmp.lt.s32.totalorder %s1604_s26, %s2033_s10 }
 0x264   : > { %p1606_p1 = scmp.ne.s32.totalorder %s1604_s26, %s1605_s1  ;;  %p1611_p10 = scmp.lt.s32.totalorder %s1609_s3, %s1605_s1 }
 0x266   : > { %v855_v43 = vpop.f32.mrf.mxu2  ;;  %p1607_p3 = pnand %p1606_p1, %p1871_p0  ;;  %p1612_p12 = por %p1611_p10, %p1610_p9 }
 0x267   : > { %1300 = vmatmul.msk.f32.vlgmr.msra.gmra.mxu3 %vm535_vm1, %v855_v43 }
 0x268   : > { %v934_v44 = vld [vmem:[#allocation2] sm:$0xff]  ;;  %p1608_p8 = pneg %p1607_p3 }
 0x269   : > { %1303 = vmatmul.msk.f32.vlgmr.msra.gmra.mxu1 %vm535_vm1, %v934_v44 }
 0x26a   : > { %p1613_p13 = pnand %p1612_p12, %p1608_p8 }
 0x28b   : > { %v613_v45 = vpop.f32.mrf.mxu3 }
 0x28c   : > { %616 = vst.msk [vmem:[#allocation4] sm:$0xff] %vm483_vm0, %v613_v45 }
 0x293   : > { %v1050_v59 = vld [vmem:[#allocation4] sm:$0xff] }
 0x2bc   : > { %v920_v46 = vpop.permute.xlu2 %919 }
 0x2bd   : > { %923 = vst.msk [vmem:[#allocation2 + $0x8] sm:$0xff] %vm535_vm1, %v920_v46 }
 0x2c4   : > { %v935_v47 = vld [vmem:[#allocation2 + $0x8] sm:$0xff] }
 0x2c5   : > { %1305 = vmatmul.msk.f32.vlgmr.msrb.gmra.mxu2 %vm535_vm1, %v935_v47 }
 0x2d3   : > { %v930_v48 = vpop.permute.xlu1 %929  ;;  %v925_v50 = vpop.permute.xlu0 %924 }
 0x2d4   : > { %v791_v49 = vpop.f32.mrf.mxu1  ;;  %933 = vst.msk [vmem:[#allocation2 + $0x18] sm:$0xff] %vm535_vm1, %v930_v48 }
 0x2d5   : > { %794 = vst.msk [vmem:[#allocation4 + $0x10] sm:$0xff] %vm483_vm0, %v791_v49 }
 0x2d6   : > { %928 = vst.msk [vmem:[#allocation2 + $0x10] sm:$0xff] %vm535_vm1, %v925_v50 }
 0x2db   : > { %v937_v51 = vld [vmem:[#allocation2 + $0x18] sm:$0xff] }
 0x2dc   : > { %1309 = vmatmul.msk.f32.vlgmr.msrb.gmra.mxu0 %vm535_vm1, %v937_v51  ;;  %v1052_v57 = vld [vmem:[#allocation4 + $0x10] sm:$0xff] }
 0x2dd   : > { %v936_v52 = vld [vmem:[#allocation2 + $0x10] sm:$0xff] }
 0x2de   : > { %1307 = vmatmul.msk.f32.vlgmr.msrb.gmra.mxu3 %vm535_vm1, %v936_v52 }
 0x2e2   : > { %v703_v53 = vpop.f32.mrf.mxu3 }
 0x2e3   : > { %706 = vst.msk [vmem:[#allocation4 + $0x8] sm:$0xff] %vm483_vm0, %v703_v53 }
 0x2e6   : > { %v965_v54 = vpop.f32.mrf.mxu1 }
 0x2e7   : > { %1046 = vst.msk [vmem:[%s469_s21] sm:$0xff] %vm535_vm1, %v965_v54 }
 0x2ea   : > { %v879_v55 = vpop.f32.mrf.mxu3  ;;  %v1051_v58 = vld [vmem:[#allocation4 + $0x8] sm:$0xff] }
 0x2eb   : > { %882 = vst.msk [vmem:[#allocation4 + $0x18] sm:$0xff] %vm483_vm0, %v879_v55 }
 0x2f2   : > { %v1053_v56 = vld [vmem:[#allocation4 + $0x18] sm:$0xff] }
 0x2f3   : > { %1072 = vmatpush.msrb.mxu1 %v1053_v56 }
 0x2f5   : > { %1073 = vmatpush.msrb.mxu1 %v1052_v57 }
 0x2f7   : > { %1074 = vmatpush.msrb.mxu1 %v1051_v58 }
 0x2f9   : > { %1075 = vmatpush.msrb.mxu1 %v1050_v59 }
 0x2fa   : > { %1310 = vmatmul.msk.f32.vlgmr.msrb.gmra.mxu1 %vm483_vm0, %v914_v40 }
 0x348   : > { %v991_v60 = vpop.f32.mrf.mxu2 }
 0x349   : > { %1047 = vst.msk [vmem:[%s469_s21 + $0x8] sm:$0xff] %vm535_vm1, %v991_v60 }
 0x359   : > { %v1043_v61 = vpop.f32.mrf.mxu0 }
 0x35a   : > { %1049 = vst.msk [vmem:[%s469_s21 + $0x18] sm:$0xff] %vm535_vm1, %v1043_v61 }
 0x361   : > { %v1017_v62 = vpop.f32.mrf.mxu3 }
 0x362   : > { %1048 = vst.msk [vmem:[%s469_s21 + $0x10] sm:$0xff] %vm535_vm1, %v1017_v62 }
 0x363   : > { %1616 = shalt.err (!%p1613_p13)
}
 0x364   : > { %s1722_s21 = smov 128   ;;  %s1723_s7 = smov 8   ;;  %v1438_v63 = vld [vmem:[%s2031_s8] ss:$0 sm:$0xff] }
 0x365   : > { %1338 = dma.vmem_to_hbm [thread:$0]  (%p1871_p0), %s1116_s20, 512, %s1118_s24, %s1087_s27, %s1722_s21, %s1722_s21, %s1723_s7  }
 0x366   : > { %s1313_s25 = sshll.u32 %s1703_s16, 3  ;;  %s2055_s1 = sshll.u32 %s1891_s28, 3 }
 0x367   : > { %s1098_s22 = scalar_lea.hbm %s2032_s9, %s1313_s25  ;;  %s462_s3 = scalar_lea.vmem [#allocation14], %s2055_s1 }
 0x368   : > { %s1100_s5 = sshll.u32 %s462_s3, 4  ;;  %s1102_s2 = sshll.u32 %s1098_s22, 4  ;;  %s1101_s5 = int_to_ptr.vmem [resolvable:$true] %s1100_s5  ;;  %s1103_s2 = int_to_ptr.hbm [resolvable:$true] %s1102_s2 }
 0x369   : > { %s1082_s16 = scalar_lea.sflag [#allocation7], %s1891_s28  ;;  %s1631_s20 = sshra.s32 %s1103_s2, 4  ;;  %s1632_s20 = int_to_ptr.hbm [resolvable:$true] %s1631_s20 }
 0x36a   : > { %s1633_s0 = scalar_lea.hbm %s1632_s20, 8  ;;  %s1637_s27 = scalar_lea.hbm %s2032_s9, 16 }
 0x36b   : > { %p1634_p2 = scmp.ne.s32.totalorder %s1632_s20, %s1633_s0  ;;  %p1638_p11 = scmp.lt.s32.totalorder %s1632_s20, %s2032_s9 }
 0x36c   : > { %p1639_p1 = scmp.lt.s32.totalorder %s1637_s27, %s1633_s0 }
 0x36d   : > { %p1635_p4 = pnand %p1634_p2, %p1871_p0 }
 0x36e   : > { %p1640_p3 = por %p1639_p1, %p1638_p11 }
 0x36f   : > { %p1636_p7 = pneg %p1635_p4 }
 0x371   : > { %p1641_p8 = pnand %p1640_p3, %p1636_p7 }
 0x377   : > { %v1077_v0 = vpop.f32.mrf.mxu1 }
 0x378   : > { %v1078_v1 = vadd.f32 %v1438_v63, %v1077_v0 }
 0x37a   : > { %1080 = vst.msk [vmem:[%s462_s3] sm:$0xff] %vm483_vm0, %v1078_v1 }
 0x37b   : > { %1644 = shalt.err (!%p1641_p8)
}
 0x37c   : > { %1337 = dma.vmem_to_hbm [thread:$0]  (%p1871_p0), %s1101_s5, 128, %s1103_s2, %s1082_s16  }
 0x37d PF: > { %s1132_s28 = sand.u32 1, %s1691_s13   ;;  %p1359_p9 = pnand %p1280_p6, %p1878_p5 }
 0x37e   : > { %s1133_s29 = scalar_lea.sflag [#allocation7], %s1132_s28 }
 0x37f   : > { %p1360_p10 = pneg %p1359_p9 }
 0x381   : > { %1682 = dma.done.wait (%p1360_p10), %s1133_s29, 128  }
 0x382   : > { %1684 = vsyncadd (%p1360_p10), %s1133_s29, 4294967168  ;;  %s1143_s22 = scalar_lea.sflag [#allocation16], %s1132_s28 }
 0x383   : > { %1686 = dma.done.wait (%p1360_p10), %s1143_s22, 512  }
 0x384   : > { %1688 = vsyncadd (%p1360_p10), %s1143_s22, 4294966784  ;;  %s32_s18 = sadd.s32 1, %s1711_s18   ;;  %s2056_s13 = smov %s1695_s14 }
 0x385   : > { %p29_p12 = scmp.ge.s32.totalorder %s32_s18, 4   ;;  %s2057_s14 = smov %s1699_s15 }
 0x386   : > { %s2058_s15 = smov %s1876_s12  ;;  %s2059_s16 = smov %s1707_s17 }
 0x387   : > { %s2060_s17 = smov %s2062_s30  ;;  %31 = sbr.rel (!%p29_p12) target bundleno = 17 (0x11), region = 144 }
 0x38c   :  { %1149 = vsyncpa [#allocation6], 1 }
 0x38d   :  { %1151 = vsyncpa [#allocation6 + $0x1], 1 }
 0x38e   :  { %1152 = vsyncpa [#allocation9], 1 }
 0x38f   :  { %1153 = vsyncpa [#allocation12], 1 }
 0x390   :  { %1154 = vsyncpa [#allocation7], 1 }
 0x391   :  { %1156 = vsyncpa [#allocation7 + $0x1], 1 }
 0x392   :  { %1157 = vsyncpa [#allocation16], 1 }
 0x393   :  { %1159 = vsyncpa [#allocation16 + $0x1], 1 }

</bundles_post_ra>
